<compile_context>
chip_gen: v6e
topology: v6e:2x2x1
jax: 0.10.0
libtpu: 0.0.40
codegen_flags: <defaults>
</compile_context>

<pallas_src>
import functools

import jax
import jax.numpy as jnp
import numpy as np
from jax.experimental import pallas as pl
from jax.experimental.pallas import tpu as pltpu

_EPS = 1e-5


def _double_conv_kernel(x_ref, w1_ref, g1_ref, be1_ref,
                        w2_ref, g2_ref, be2_ref, out_ref):
    # x_ref : (N, Cin, L)          NCL, length on lanes
    # w1_ref: (3, Cmid, Cin)       tap-major conv1 weights
    # w2_ref: (3, Cout, Cmid)      tap-major conv2 weights
    # g/be  : (C, 1)               BatchNorm affine params
    # out_ref: (N, Cout, L)        NCL output (lane-dense stores)
    N, Cout, L = out_ref.shape
    Cmid = w1_ref.shape[1]

    # Constant LxL shift matrices (built once; contraction runs on the MXU).
    #   (v @ s_left )[c, l] = v[c, l-1], 0 at l = 0
    #   (v @ s_right)[c, l] = v[c, l+1], 0 at l = L-1
    li = jax.lax.broadcasted_iota(jnp.int32, (L, L), 0)
    lj = jax.lax.broadcasted_iota(jnp.int32, (L, L), 1)
    s_left = (lj == li + 1).astype(jnp.float32)
    s_right = (lj == li - 1).astype(jnp.float32)

    inv_m = 1.0 / float(N * L)

    def conv3(v, w_ref):
        # v: (C_in, L) register-resident; w_ref: (3, C_out, C_in)
        vl = jnp.dot(v, s_left, preferred_element_type=jnp.float32)
        vr = jnp.dot(v, s_right, preferred_element_type=jnp.float32)
        # accumulate straight from the first dot (no zeros+add)
        y = jnp.dot(w_ref[0], vl, preferred_element_type=jnp.float32)
        y = y + jnp.dot(w_ref[1], v, preferred_element_type=jnp.float32)
        y = y + jnp.dot(w_ref[2], vr, preferred_element_type=jnp.float32)
        return y

    # ---------------- conv1 + batch stats (one pass) ----------------
    sum1 = jnp.zeros((Cmid, 1), jnp.float32)
    ssq1 = jnp.zeros((Cmid, 1), jnp.float32)
    y1 = []
    for n in range(N):                       # N is small & static -> unrolled
        y = conv3(x_ref[n].astype(jnp.float32), w1_ref)   # (Cmid, L)
        y1.append(y)
        sum1 = sum1 + jnp.sum(y, axis=1, keepdims=True)
        ssq1 = ssq1 + jnp.sum(y * y, axis=1, keepdims=True)

    mean1 = sum1 * inv_m
    var1 = jnp.maximum(ssq1 * inv_m - mean1 * mean1, 0.0)
    scale1 = g1_ref[...] * jax.lax.rsqrt(var1 + _EPS)
    shift1 = be1_ref[...] - mean1 * scale1

    # ---------------- bn1+relu fused, conv2 + batch stats ----------------
    sum2 = jnp.zeros((Cout, 1), jnp.float32)
    ssq2 = jnp.zeros((Cout, 1), jnp.float32)
    y2 = []
    for n in range(N):
        h = jnp.maximum(y1[n] * scale1 + shift1, 0.0)      # (Cmid, L), no scratch
        y = conv3(h, w2_ref)                               # (Cout, L)
        y2.append(y)
        sum2 = sum2 + jnp.sum(y, axis=1, keepdims=True)
        ssq2 = ssq2 + jnp.sum(y * y, axis=1, keepdims=True)

    mean2 = sum2 * inv_m
    var2 = jnp.maximum(ssq2 * inv_m - mean2 * mean2, 0.0)
    scale2 = g2_ref[...] * jax.lax.rsqrt(var2 + _EPS)
    shift2 = be2_ref[...] - mean2 * scale2

    # ---------------- bn2 + relu, lane-dense NCL store ----------------
    for n in range(N):
        out_ref[n, :, :] = jnp.maximum(y2[n] * scale2 + shift2,
                                       0.0).astype(out_ref.dtype)


@jax.jit
def double_conv(x_ncl, w1, b1, g1, be1, w2, b2, g2, be2):
    """x_ncl: (N, Cin, L) float32. Conv weights in PyTorch layout (Co, Ci, 3).

    b1/b2 are accepted for API parity but cancel exactly under training-mode
    BatchNorm, so they are not passed to the kernel.
    """
    N, Cin, L = x_ncl.shape
    Cmid = w1.shape[0]
    Cout = w2.shape[0]

    # tap-major weight relayout: (Co, Ci, 3) -> (3, Co, Ci)
    w1k = jnp.transpose(w1, (2, 0, 1)).astype(jnp.float32)
    w2k = jnp.transpose(w2, (2, 0, 1)).astype(jnp.float32)
    g1c = g1.reshape(Cmid, 1).astype(jnp.float32)
    be1c = be1.reshape(Cmid, 1).astype(jnp.float32)
    g2c = g2.reshape(Cout, 1).astype(jnp.float32)
    be2c = be2.reshape(Cout, 1).astype(jnp.float32)

    vmem = pl.BlockSpec(memory_space=pltpu.MemorySpace.VMEM)
    return pl.pallas_call(
        _double_conv_kernel,
        out_shape=jax.ShapeDtypeStruct((N, Cout, L), jnp.float32),
        in_specs=[vmem] * 7,
        out_specs=vmem,
    )(x_ncl.astype(jnp.float32), w1k, g1c, be1c, w2k, g2c, be2c)


def _reference(x_ncl, w1, b1, g1, be1, w2, b2, g2, be2):
    """Pure-JAX reference mirroring PyTorch Conv1d + training-mode BatchNorm1d + ReLU."""
    def block(x, w, b, g, be):
        y = jax.lax.conv_general_dilated(
            x, w, window_strides=(1,), padding=((1, 1),),
            dimension_numbers=('NCH', 'OIH', 'NCH'))
        y = y + b[None, :, None]
        mean = jnp.mean(y, axis=(0, 2), keepdims=True)
        var = jnp.mean((y - mean) ** 2, axis=(0, 2), keepdims=True)
        y = (y - mean) * jax.lax.rsqrt(var + _EPS) * g[None, :, None] + be[None, :, None]
        return jnp.maximum(y, 0.0)

    h = block(x_ncl, w1, b1, g1, be1)
    return block(h, w2, b2, g2, be2)


if __name__ == "__main__":
    N, Cin, Cout, L = 2, 4, 8, 16   # in_ch=4, out_ch=8, seq length 16

    key = jax.random.PRNGKey(0)
    ks = jax.random.split(key, 9)
    x = jax.random.normal(ks[0], (N, Cin, L), jnp.float32)

    # deterministic synthetic parameters (shapes match the PyTorch module)
    w1 = 0.3 * jax.random.normal(ks[1], (Cout, Cin, 3), jnp.float32)
    b1 = 0.1 * jax.random.normal(ks[2], (Cout,), jnp.float32)
    g1 = 1.0 + 0.1 * jax.random.normal(ks[3], (Cout,), jnp.float32)
    be1 = 0.1 * jax.random.normal(ks[4], (Cout,), jnp.float32)
    w2 = 0.3 * jax.random.normal(ks[5], (Cout, Cout, 3), jnp.float32)
    b2 = 0.1 * jax.random.normal(ks[6], (Cout,), jnp.float32)
    g2 = 1.0 + 0.1 * jax.random.normal(ks[7], (Cout,), jnp.float32)
    be2 = 0.1 * jax.random.normal(ks[8], (Cout,), jnp.float32)

    out = double_conv(x, w1, b1, g1, be1, w2, b2, g2, be2)
    jax.block_until_ready(out)

    ref = _reference(x, w1, b1, g1, be1, w2, b2, g2, be2)
    np.testing.assert_allclose(np.asarray(out), np.asarray(ref), rtol=1e-3, atol=1e-3)

    # TODO(synk): PyTorch training-mode BN also updates running_mean/running_var
    # buffers (side effect only; does not affect the returned tensor) — not modeled.
    print("KERNEL_OK")
</pallas_src>

<mosaic_0001>
module attributes {stable_mosaic.version = 11 : i64} {
  func.func @_double_conv_kernel(%arg0: memref<2x4x16xf32, #tpu.memory_space<vmem>>, %arg1: memref<3x8x4xf32, #tpu.memory_space<vmem>>, %arg2: memref<8x1xf32, #tpu.memory_space<vmem>>, %arg3: memref<8x1xf32, #tpu.memory_space<vmem>>, %arg4: memref<3x8x8xf32, #tpu.memory_space<vmem>>, %arg5: memref<8x1xf32, #tpu.memory_space<vmem>>, %arg6: memref<8x1xf32, #tpu.memory_space<vmem>>, %arg7: memref<2x8x16xf32, #tpu.memory_space<vmem>>) attributes {dimension_semantics = [], scalar_prefetch = 0 : i64, scratch_operands = 0 : i64, tpu.core_type = #tpu.core_type<tc>} {
    %0 = tpu.iota {dimensions = array<i32: 0>} : vector<16x16xi32>
    %1 = tpu.iota {dimensions = array<i32: 1>} : vector<16x16xi32>
    %c1_i32 = arith.constant 1 : i32
    %2 = vector.broadcast %c1_i32 : i32 to vector<16x16xi32>
    %3 = arith.addi %0, %2 : vector<16x16xi32>
    %4 = arith.cmpi eq, %1, %3 : vector<16x16xi32>
    %5 = arith.extui %4 : vector<16x16xi1> to vector<16x16xi32>
    %6 = arith.sitofp %5 : vector<16x16xi32> to vector<16x16xf32>
    %c1_i32_0 = arith.constant 1 : i32
    %7 = vector.broadcast %c1_i32_0 : i32 to vector<16x16xi32>
    %8 = arith.subi %0, %7 : vector<16x16xi32>
    %9 = arith.cmpi eq, %1, %8 : vector<16x16xi32>
    %10 = arith.extui %9 : vector<16x16xi1> to vector<16x16xi32>
    %11 = arith.sitofp %10 : vector<16x16xi32> to vector<16x16xf32>
    %cst = arith.constant 0.000000e+00 : f32
    %12 = vector.broadcast %cst : f32 to vector<8x1xf32>
    %cst_1 = arith.constant 0.000000e+00 : f32
    %13 = vector.broadcast %cst_1 : f32 to vector<8x1xf32>
    %c0 = arith.constant 0 : index
    %c0_2 = arith.constant 0 : index
    %c0_3 = arith.constant 0 : index
    %14 = vector.load %arg0[%c0, %c0_2, %c0_3] : memref<2x4x16xf32, #tpu.memory_space<vmem>>, vector<1x4x16xf32>
    %15 = vector.shape_cast %14 : vector<1x4x16xf32> to vector<4x16xf32>
    %cst_4 = arith.constant dense<0.000000e+00> : vector<4x16xf32>
    %16 = tpu.matmul %15, %6, %cst_4 {dimension_numbers = #tpu.dot_dimension_numbers<[1], [0], [0], [1], [0, 0, 1, 1], [], []>} : vector<4x16xf32>, vector<16x16xf32>, vector<4x16xf32> -> vector<4x16xf32>
    %cst_5 = arith.constant dense<0.000000e+00> : vector<4x16xf32>
    %17 = tpu.matmul %15, %11, %cst_5 {dimension_numbers = #tpu.dot_dimension_numbers<[1], [0], [0], [1], [0, 0, 1, 1], [], []>} : vector<4x16xf32>, vector<16x16xf32>, vector<4x16xf32> -> vector<4x16xf32>
    %c0_6 = arith.constant 0 : index
    %c0_7 = arith.constant 0 : index
    %c0_8 = arith.constant 0 : index
    %18 = vector.load %arg1[%c0_6, %c0_7, %c0_8] : memref<3x8x4xf32, #tpu.memory_space<vmem>>, vector<1x8x4xf32>
    %19 = vector.shape_cast %18 : vector<1x8x4xf32> to vector<8x4xf32>
    %cst_9 = arith.constant dense<0.000000e+00> : vector<8x16xf32>
    %20 = tpu.matmul %19, %16, %cst_9 {dimension_numbers = #tpu.dot_dimension_numbers<[1], [0], [0], [1], [0, 0, 1, 1], [], []>} : vector<8x4xf32>, vector<4x16xf32>, vector<8x16xf32> -> vector<8x16xf32>
    %c1 = arith.constant 1 : index
    %c0_10 = arith.constant 0 : index
    %c0_11 = arith.constant 0 : index
    %21 = vector.load %arg1[%c1, %c0_10, %c0_11] : memref<3x8x4xf32, #tpu.memory_space<vmem>>, vector<1x8x4xf32>
    %22 = vector.shape_cast %21 : vector<1x8x4xf32> to vector<8x4xf32>
    %cst_12 = arith.constant dense<0.000000e+00> : vector<8x16xf32>
    %23 = tpu.matmul %22, %15, %cst_12 {dimension_numbers = #tpu.dot_dimension_numbers<[1], [0], [0], [1], [0, 0, 1, 1], [], []>} : vector<8x4xf32>, vector<4x16xf32>, vector<8x16xf32> -> vector<8x16xf32>
    %24 = arith.addf %20, %23 : vector<8x16xf32>
    %c2 = arith.constant 2 : index
    %c0_13 = arith.constant 0 : index
    %c0_14 = arith.constant 0 : index
    %25 = vector.load %arg1[%c2, %c0_13, %c0_14] : memref<3x8x4xf32, #tpu.memory_space<vmem>>, vector<1x8x4xf32>
    %26 = vector.shape_cast %25 : vector<1x8x4xf32> to vector<8x4xf32>
    %cst_15 = arith.constant dense<0.000000e+00> : vector<8x16xf32>
    %27 = tpu.matmul %26, %17, %cst_15 {dimension_numbers = #tpu.dot_dimension_numbers<[1], [0], [0], [1], [0, 0, 1, 1], [], []>} : vector<8x4xf32>, vector<4x16xf32>, vector<8x16xf32> -> vector<8x16xf32>
    %28 = arith.addf %24, %27 : vector<8x16xf32>
    %cst_16 = arith.constant dense<0.000000e+00> : vector<8xf32>
    %29 = vector.multi_reduction <add>, %28, %cst_16 [1] : vector<8x16xf32> to vector<8xf32>
    %30 = vector.shape_cast %29 : vector<8xf32> to vector<8x1xf32>
    %31 = arith.addf %12, %30 : vector<8x1xf32>
    %32 = arith.mulf %28, %28 : vector<8x16xf32>
    %cst_17 = arith.constant dense<0.000000e+00> : vector<8xf32>
    %33 = vector.multi_reduction <add>, %32, %cst_17 [1] : vector<8x16xf32> to vector<8xf32>
    %34 = vector.shape_cast %33 : vector<8xf32> to vector<8x1xf32>
    %35 = arith.addf %13, %34 : vector<8x1xf32>
    %c1_18 = arith.constant 1 : index
    %c0_19 = arith.constant 0 : index
    %c0_20 = arith.constant 0 : index
    %36 = vector.load %arg0[%c1_18, %c0_19, %c0_20] : memref<2x4x16xf32, #tpu.memory_space<vmem>>, vector<1x4x16xf32>
    %37 = vector.shape_cast %36 : vector<1x4x16xf32> to vector<4x16xf32>
    %cst_21 = arith.constant dense<0.000000e+00> : vector<4x16xf32>
    %38 = tpu.matmul %37, %6, %cst_21 {dimension_numbers = #tpu.dot_dimension_numbers<[1], [0], [0], [1], [0, 0, 1, 1], [], []>} : vector<4x16xf32>, vector<16x16xf32>, vector<4x16xf32> -> vector<4x16xf32>
    %cst_22 = arith.constant dense<0.000000e+00> : vector<4x16xf32>
    %39 = tpu.matmul %37, %11, %cst_22 {dimension_numbers = #tpu.dot_dimension_numbers<[1], [0], [0], [1], [0, 0, 1, 1], [], []>} : vector<4x16xf32>, vector<16x16xf32>, vector<4x16xf32> -> vector<4x16xf32>
    %c0_23 = arith.constant 0 : index
    %c0_24 = arith.constant 0 : index
    %c0_25 = arith.constant 0 : index
    %40 = vector.load %arg1[%c0_23, %c0_24, %c0_25] : memref<3x8x4xf32, #tpu.memory_space<vmem>>, vector<1x8x4xf32>
    %41 = vector.shape_cast %40 : vector<1x8x4xf32> to vector<8x4xf32>
    %cst_26 = arith.constant dense<0.000000e+00> : vector<8x16xf32>
    %42 = tpu.matmul %41, %38, %cst_26 {dimension_numbers = #tpu.dot_dimension_numbers<[1], [0], [0], [1], [0, 0, 1, 1], [], []>} : vector<8x4xf32>, vector<4x16xf32>, vector<8x16xf32> -> vector<8x16xf32>
    %c1_27 = arith.constant 1 : index
    %c0_28 = arith.constant 0 : index
    %c0_29 = arith.constant 0 : index
    %43 = vector.load %arg1[%c1_27, %c0_28, %c0_29] : memref<3x8x4xf32, #tpu.memory_space<vmem>>, vector<1x8x4xf32>
    %44 = vector.shape_cast %43 : vector<1x8x4xf32> to vector<8x4xf32>
    %cst_30 = arith.constant dense<0.000000e+00> : vector<8x16xf32>
    %45 = tpu.matmul %44, %37, %cst_30 {dimension_numbers = #tpu.dot_dimension_numbers<[1], [0], [0], [1], [0, 0, 1, 1], [], []>} : vector<8x4xf32>, vector<4x16xf32>, vector<8x16xf32> -> vector<8x16xf32>
    %46 = arith.addf %42, %45 : vector<8x16xf32>
    %c2_31 = arith.constant 2 : index
    %c0_32 = arith.constant 0 : index
    %c0_33 = arith.constant 0 : index
    %47 = vector.load %arg1[%c2_31, %c0_32, %c0_33] : memref<3x8x4xf32, #tpu.memory_space<vmem>>, vector<1x8x4xf32>
    %48 = vector.shape_cast %47 : vector<1x8x4xf32> to vector<8x4xf32>
    %cst_34 = arith.constant dense<0.000000e+00> : vector<8x16xf32>
    %49 = tpu.matmul %48, %39, %cst_34 {dimension_numbers = #tpu.dot_dimension_numbers<[1], [0], [0], [1], [0, 0, 1, 1], [], []>} : vector<8x4xf32>, vector<4x16xf32>, vector<8x16xf32> -> vector<8x16xf32>
    %50 = arith.addf %46, %49 : vector<8x16xf32>
    %cst_35 = arith.constant dense<0.000000e+00> : vector<8xf32>
    %51 = vector.multi_reduction <add>, %50, %cst_35 [1] : vector<8x16xf32> to vector<8xf32>
    %52 = vector.shape_cast %51 : vector<8xf32> to vector<8x1xf32>
    %53 = arith.addf %31, %52 : vector<8x1xf32>
    %54 = arith.mulf %50, %50 : vector<8x16xf32>
    %cst_36 = arith.constant dense<0.000000e+00> : vector<8xf32>
    %55 = vector.multi_reduction <add>, %54, %cst_36 [1] : vector<8x16xf32> to vector<8xf32>
    %56 = vector.shape_cast %55 : vector<8xf32> to vector<8x1xf32>
    %57 = arith.addf %35, %56 : vector<8x1xf32>
    %cst_37 = arith.constant 3.125000e-02 : f32
    %58 = vector.broadcast %cst_37 : f32 to vector<8x1xf32>
    %59 = arith.mulf %53, %58 : vector<8x1xf32>
    %cst_38 = arith.constant 3.125000e-02 : f32
    %60 = vector.broadcast %cst_38 : f32 to vector<8x1xf32>
    %61 = arith.mulf %57, %60 : vector<8x1xf32>
    %62 = arith.mulf %59, %59 : vector<8x1xf32>
    %63 = arith.subf %61, %62 : vector<8x1xf32>
    %cst_39 = arith.constant 0.000000e+00 : f32
    %64 = vector.broadcast %cst_39 : f32 to vector<8x1xf32>
    %65 = arith.maximumf %63, %64 : vector<8x1xf32>
    %c0_40 = arith.constant 0 : index
    %c0_41 = arith.constant 0 : index
    %66 = vector.load %arg2[%c0_40, %c0_41] : memref<8x1xf32, #tpu.memory_space<vmem>>, vector<8x1xf32>
    %cst_42 = arith.constant 9.99999974E-6 : f32
    %67 = vector.broadcast %cst_42 : f32 to vector<8x1xf32>
    %68 = arith.addf %65, %67 : vector<8x1xf32>
    %69 = math.rsqrt %68 : vector<8x1xf32>
    %70 = arith.mulf %66, %69 : vector<8x1xf32>
    %c0_43 = arith.constant 0 : index
    %c0_44 = arith.constant 0 : index
    %71 = vector.load %arg3[%c0_43, %c0_44] : memref<8x1xf32, #tpu.memory_space<vmem>>, vector<8x1xf32>
    %72 = arith.mulf %59, %70 : vector<8x1xf32>
    %73 = arith.subf %71, %72 : vector<8x1xf32>
    %cst_45 = arith.constant 0.000000e+00 : f32
    %74 = vector.broadcast %cst_45 : f32 to vector<8x1xf32>
    %cst_46 = arith.constant 0.000000e+00 : f32
    %75 = vector.broadcast %cst_46 : f32 to vector<8x1xf32>
    %76 = vector.broadcast %70 : vector<8x1xf32> to vector<8x16xf32>
    %77 = arith.mulf %28, %76 : vector<8x16xf32>
    %78 = vector.broadcast %73 : vector<8x1xf32> to vector<8x16xf32>
    %79 = arith.addf %77, %78 : vector<8x16xf32>
    %cst_47 = arith.constant 0.000000e+00 : f32
    %80 = vector.broadcast %cst_47 : f32 to vector<8x16xf32>
    %81 = arith.maximumf %79, %80 : vector<8x16xf32>
    %cst_48 = arith.constant dense<0.000000e+00> : vector<8x16xf32>
    %82 = tpu.matmul %81, %6, %cst_48 {dimension_numbers = #tpu.dot_dimension_numbers<[1], [0], [0], [1], [0, 0, 1, 1], [], []>} : vector<8x16xf32>, vector<16x16xf32>, vector<8x16xf32> -> vector<8x16xf32>
    %cst_49 = arith.constant dense<0.000000e+00> : vector<8x16xf32>
    %83 = tpu.matmul %81, %11, %cst_49 {dimension_numbers = #tpu.dot_dimension_numbers<[1], [0], [0], [1], [0, 0, 1, 1], [], []>} : vector<8x16xf32>, vector<16x16xf32>, vector<8x16xf32> -> vector<8x16xf32>
    %c0_50 = arith.constant 0 : index
    %c0_51 = arith.constant 0 : index
    %c0_52 = arith.constant 0 : index
    %84 = vector.load %arg4[%c0_50, %c0_51, %c0_52] : memref<3x8x8xf32, #tpu.memory_space<vmem>>, vector<1x8x8xf32>
    %85 = vector.shape_cast %84 : vector<1x8x8xf32> to vector<8x8xf32>
    %cst_53 = arith.constant dense<0.000000e+00> : vector<8x16xf32>
    %86 = tpu.matmul %85, %82, %cst_53 {dimension_numbers = #tpu.dot_dimension_numbers<[1], [0], [0], [1], [0, 0, 1, 1], [], []>} : vector<8x8xf32>, vector<8x16xf32>, vector<8x16xf32> -> vector<8x16xf32>
    %c1_54 = arith.constant 1 : index
    %c0_55 = arith.constant 0 : index
    %c0_56 = arith.constant 0 : index
    %87 = vector.load %arg4[%c1_54, %c0_55, %c0_56] : memref<3x8x8xf32, #tpu.memory_space<vmem>>, vector<1x8x8xf32>
    %88 = vector.shape_cast %87 : vector<1x8x8xf32> to vector<8x8xf32>
    %cst_57 = arith.constant dense<0.000000e+00> : vector<8x16xf32>
    %89 = tpu.matmul %88, %81, %cst_57 {dimension_numbers = #tpu.dot_dimension_numbers<[1], [0], [0], [1], [0, 0, 1, 1], [], []>} : vector<8x8xf32>, vector<8x16xf32>, vector<8x16xf32> -> vector<8x16xf32>
    %90 = arith.addf %86, %89 : vector<8x16xf32>
    %c2_58 = arith.constant 2 : index
    %c0_59 = arith.constant 0 : index
    %c0_60 = arith.constant 0 : index
    %91 = vector.load %arg4[%c2_58, %c0_59, %c0_60] : memref<3x8x8xf32, #tpu.memory_space<vmem>>, vector<1x8x8xf32>
    %92 = vector.shape_cast %91 : vector<1x8x8xf32> to vector<8x8xf32>
    %cst_61 = arith.constant dense<0.000000e+00> : vector<8x16xf32>
    %93 = tpu.matmul %92, %83, %cst_61 {dimension_numbers = #tpu.dot_dimension_numbers<[1], [0], [0], [1], [0, 0, 1, 1], [], []>} : vector<8x8xf32>, vector<8x16xf32>, vector<8x16xf32> -> vector<8x16xf32>
    %94 = arith.addf %90, %93 : vector<8x16xf32>
    %cst_62 = arith.constant dense<0.000000e+00> : vector<8xf32>
    %95 = vector.multi_reduction <add>, %94, %cst_62 [1] : vector<8x16xf32> to vector<8xf32>
    %96 = vector.shape_cast %95 : vector<8xf32> to vector<8x1xf32>
    %97 = arith.addf %74, %96 : vector<8x1xf32>
    %98 = arith.mulf %94, %94 : vector<8x16xf32>
    %cst_63 = arith.constant dense<0.000000e+00> : vector<8xf32>
    %99 = vector.multi_reduction <add>, %98, %cst_63 [1] : vector<8x16xf32> to vector<8xf32>
    %100 = vector.shape_cast %99 : vector<8xf32> to vector<8x1xf32>
    %101 = arith.addf %75, %100 : vector<8x1xf32>
    %102 = vector.broadcast %70 : vector<8x1xf32> to vector<8x16xf32>
    %103 = arith.mulf %50, %102 : vector<8x16xf32>
    %104 = vector.broadcast %73 : vector<8x1xf32> to vector<8x16xf32>
    %105 = arith.addf %103, %104 : vector<8x16xf32>
    %cst_64 = arith.constant 0.000000e+00 : f32
    %106 = vector.broadcast %cst_64 : f32 to vector<8x16xf32>
    %107 = arith.maximumf %105, %106 : vector<8x16xf32>
    %cst_65 = arith.constant dense<0.000000e+00> : vector<8x16xf32>
    %108 = tpu.matmul %107, %6, %cst_65 {dimension_numbers = #tpu.dot_dimension_numbers<[1], [0], [0], [1], [0, 0, 1, 1], [], []>} : vector<8x16xf32>, vector<16x16xf32>, vector<8x16xf32> -> vector<8x16xf32>
    %cst_66 = arith.constant dense<0.000000e+00> : vector<8x16xf32>
    %109 = tpu.matmul %107, %11, %cst_66 {dimension_numbers = #tpu.dot_dimension_numbers<[1], [0], [0], [1], [0, 0, 1, 1], [], []>} : vector<8x16xf32>, vector<16x16xf32>, vector<8x16xf32> -> vector<8x16xf32>
    %c0_67 = arith.constant 0 : index
    %c0_68 = arith.constant 0 : index
    %c0_69 = arith.constant 0 : index
    %110 = vector.load %arg4[%c0_67, %c0_68, %c0_69] : memref<3x8x8xf32, #tpu.memory_space<vmem>>, vector<1x8x8xf32>
    %111 = vector.shape_cast %110 : vector<1x8x8xf32> to vector<8x8xf32>
    %cst_70 = arith.constant dense<0.000000e+00> : vector<8x16xf32>
    %112 = tpu.matmul %111, %108, %cst_70 {dimension_numbers = #tpu.dot_dimension_numbers<[1], [0], [0], [1], [0, 0, 1, 1], [], []>} : vector<8x8xf32>, vector<8x16xf32>, vector<8x16xf32> -> vector<8x16xf32>
    %c1_71 = arith.constant 1 : index
    %c0_72 = arith.constant 0 : index
    %c0_73 = arith.constant 0 : index
    %113 = vector.load %arg4[%c1_71, %c0_72, %c0_73] : memref<3x8x8xf32, #tpu.memory_space<vmem>>, vector<1x8x8xf32>
    %114 = vector.shape_cast %113 : vector<1x8x8xf32> to vector<8x8xf32>
    %cst_74 = arith.constant dense<0.000000e+00> : vector<8x16xf32>
    %115 = tpu.matmul %114, %107, %cst_74 {dimension_numbers = #tpu.dot_dimension_numbers<[1], [0], [0], [1], [0, 0, 1, 1], [], []>} : vector<8x8xf32>, vector<8x16xf32>, vector<8x16xf32> -> vector<8x16xf32>
    %116 = arith.addf %112, %115 : vector<8x16xf32>
    %c2_75 = arith.constant 2 : index
    %c0_76 = arith.constant 0 : index
    %c0_77 = arith.constant 0 : index
    %117 = vector.load %arg4[%c2_75, %c0_76, %c0_77] : memref<3x8x8xf32, #tpu.memory_space<vmem>>, vector<1x8x8xf32>
    %118 = vector.shape_cast %117 : vector<1x8x8xf32> to vector<8x8xf32>
    %cst_78 = arith.constant dense<0.000000e+00> : vector<8x16xf32>
    %119 = tpu.matmul %118, %109, %cst_78 {dimension_numbers = #tpu.dot_dimension_numbers<[1], [0], [0], [1], [0, 0, 1, 1], [], []>} : vector<8x8xf32>, vector<8x16xf32>, vector<8x16xf32> -> vector<8x16xf32>
    %120 = arith.addf %116, %119 : vector<8x16xf32>
    %cst_79 = arith.constant dense<0.000000e+00> : vector<8xf32>
    %121 = vector.multi_reduction <add>, %120, %cst_79 [1] : vector<8x16xf32> to vector<8xf32>
    %122 = vector.shape_cast %121 : vector<8xf32> to vector<8x1xf32>
    %123 = arith.addf %97, %122 : vector<8x1xf32>
    %124 = arith.mulf %120, %120 : vector<8x16xf32>
    %cst_80 = arith.constant dense<0.000000e+00> : vector<8xf32>
    %125 = vector.multi_reduction <add>, %124, %cst_80 [1] : vector<8x16xf32> to vector<8xf32>
    %126 = vector.shape_cast %125 : vector<8xf32> to vector<8x1xf32>
    %127 = arith.addf %101, %126 : vector<8x1xf32>
    %cst_81 = arith.constant 3.125000e-02 : f32
    %128 = vector.broadcast %cst_81 : f32 to vector<8x1xf32>
    %129 = arith.mulf %123, %128 : vector<8x1xf32>
    %cst_82 = arith.constant 3.125000e-02 : f32
    %130 = vector.broadcast %cst_82 : f32 to vector<8x1xf32>
    %131 = arith.mulf %127, %130 : vector<8x1xf32>
    %132 = arith.mulf %129, %129 : vector<8x1xf32>
    %133 = arith.subf %131, %132 : vector<8x1xf32>
    %cst_83 = arith.constant 0.000000e+00 : f32
    %134 = vector.broadcast %cst_83 : f32 to vector<8x1xf32>
    %135 = arith.maximumf %133, %134 : vector<8x1xf32>
    %c0_84 = arith.constant 0 : index
    %c0_85 = arith.constant 0 : index
    %136 = vector.load %arg5[%c0_84, %c0_85] : memref<8x1xf32, #tpu.memory_space<vmem>>, vector<8x1xf32>
    %cst_86 = arith.constant 9.99999974E-6 : f32
    %137 = vector.broadcast %cst_86 : f32 to vector<8x1xf32>
    %138 = arith.addf %135, %137 : vector<8x1xf32>
    %139 = math.rsqrt %138 : vector<8x1xf32>
    %140 = arith.mulf %136, %139 : vector<8x1xf32>
    %c0_87 = arith.constant 0 : index
    %c0_88 = arith.constant 0 : index
    %141 = vector.load %arg6[%c0_87, %c0_88] : memref<8x1xf32, #tpu.memory_space<vmem>>, vector<8x1xf32>
    %142 = arith.mulf %129, %140 : vector<8x1xf32>
    %143 = arith.subf %141, %142 : vector<8x1xf32>
    %144 = vector.broadcast %140 : vector<8x1xf32> to vector<8x16xf32>
    %145 = arith.mulf %94, %144 : vector<8x16xf32>
    %146 = vector.broadcast %143 : vector<8x1xf32> to vector<8x16xf32>
    %147 = arith.addf %145, %146 : vector<8x16xf32>
    %cst_89 = arith.constant 0.000000e+00 : f32
    %148 = vector.broadcast %cst_89 : f32 to vector<8x16xf32>
    %149 = arith.maximumf %147, %148 : vector<8x16xf32>
    %c0_90 = arith.constant 0 : index
    %c0_91 = arith.constant 0 : index
    %c0_92 = arith.constant 0 : index
    %150 = vector.load %arg7[%c0_90, %c0_91, %c0_92] : memref<2x8x16xf32, #tpu.memory_space<vmem>>, vector<1x8x16xf32>
    %151 = vector.shape_cast %150 : vector<1x8x16xf32> to vector<8x16xf32>
    %152 = vector.shape_cast %149 : vector<8x16xf32> to vector<1x8x16xf32>
    tpu.vector_store %arg7[%c0_90, %c0_91, %c0_92], %152 {strides = array<i32>} : memref<2x8x16xf32, #tpu.memory_space<vmem>>, vector<1x8x16xf32>,
    %153 = vector.broadcast %140 : vector<8x1xf32> to vector<8x16xf32>
    %154 = arith.mulf %120, %153 : vector<8x16xf32>
    %155 = vector.broadcast %143 : vector<8x1xf32> to vector<8x16xf32>
    %156 = arith.addf %154, %155 : vector<8x16xf32>
    %cst_93 = arith.constant 0.000000e+00 : f32
    %157 = vector.broadcast %cst_93 : f32 to vector<8x16xf32>
    %158 = arith.maximumf %156, %157 : vector<8x16xf32>
    %c1_94 = arith.constant 1 : index
    %c0_95 = arith.constant 0 : index
    %c0_96 = arith.constant 0 : index
    %159 = vector.load %arg7[%c1_94, %c0_95, %c0_96] : memref<2x8x16xf32, #tpu.memory_space<vmem>>, vector<1x8x16xf32>
    %160 = vector.shape_cast %159 : vector<1x8x16xf32> to vector<8x16xf32>
    %161 = vector.shape_cast %158 : vector<8x16xf32> to vector<1x8x16xf32>
    tpu.vector_store %arg7[%c1_94, %c0_95, %c0_96], %161 {strides = array<i32>} : memref<2x8x16xf32, #tpu.memory_space<vmem>>, vector<1x8x16xf32>,
    return
  }
}

</mosaic_0001>

<bundles_post_ra>
// kernel: double_conv.1
= control target key start
LH: loop header
LB: loop body
LE: loop exit
PB: predicated region body
PF: predicated region fallthrough
CT: control target
= control target key end

     0   :  { %v27_v0 = vlaneseq  ;;  %v1878_v1 = vmov 0.0   ;;  %s2156_s0 = inlined_call_operand.vmem [shape: f32[2,4,16], index: 0, kind: input, shape index: {}]   ;;  %s2157_s1 = inlined_call_operand.vmem [shape: f32[3,8,4], index: 1, kind: input, shape index: {}]   ;;  %s2158_s2 = inlined_call_operand.vmem [shape: f32[8,1], index: 2, kind: input, shape index: {}]   ;;  %s2159_s3 = inlined_call_operand.vmem [shape: f32[8,1], index: 3, kind: input, shape index: {}]   ;;  %s2160_s4 = inlined_call_operand.vmem [shape: f32[3,8,8], index: 4, kind: input, shape index: {}]   ;;  %s2161_s5 = inlined_call_operand.vmem [shape: f32[8,1], index: 5, kind: input, shape index: {}]   ;;  %s2162_s6 = inlined_call_operand.vmem [shape: f32[8,1], index: 6, kind: input, shape index: {}]   ;;  %s2163_s7 = inlined_call_operand.hbm [shape: f32[2,8,16], index: 7, kind: output, shape index: {}]  }
   0x1   :  { %1727 = vmatprep.subr.mxu0 %v1878_v1  ;;  %1734 = vmatprep.subr.mxu1 %v1878_v1 }
   0x2   :  { %12 = vsyncpa [#allocation3], 0  ;;  %v28_v2 = vshrl.u32 %v27_v0, 7  ;;  %vm1879_vm0 = vmmov 0   ;;  %v1931_v4 = vand.u32 127, %v27_v0  ;;  %v1880_v9 = vmov 1.0  }
   0x3   :  { %1731 = vmatprep.mubr.msk.f32.mxu0 %vm1879_vm0, %v1878_v1  ;;  %1738 = vmatprep.mubr.msk.f32.mxu1 %vm1879_vm0, %v1878_v1  ;;  %v48_v10 = vld [vmem:[%s2156_s0] sm:$0xf]  ;;  %vm49_vm5 = vcmask 130048   ;;  %vm200_vm6 = vcmask 1043456   ;;  %v1638_v11 = vld [vmem:[%s2157_s1 + $0x8] sm:$0xff]  ;;  %vm196_vm7 = vcmask 31744  }
   0x4   :  { %v29_v3 = vadd.s32 8, %v28_v2  ;;  %v1933_v5 = vadd.s32 1, %v28_v2  ;;  %v1935_v6 = vadd.s32 4294967295, %v28_v2  ;;  %v193_v12 = vld [vmem:[%s2157_s1] sm:$0xff]  ;;  %v1643_v13 = vld [vmem:[%s2157_s1 + $0x10] sm:$0xff]  ;;  %v1881_v45 = vmov 0  }
   0x5   :  { %v1646_v19 = vld [vmem:[%s2156_s0 + $0x4] sm:$0xf]  ;;  %1850 = vset.pattern.permute.xlu0 %v1881_v45  ;;  %1851 = vset.pattern.permute.xlu1 %v1881_v45  ;;  %vm981_vm8 = vcmask 64512   ;;  %s1882_s20 = smov [#allocation2]  }
   0x6   :  { %v1937_v7 = vadd.s32 1, %v29_v3  ;;  %v1939_v8 = vadd.s32 4294967295, %v29_v3  ;;  %vm34_vm3 = vcmp.eq.s32.totalorder %v1931_v4, %v1933_v5  ;;  %vm42_vm4 = vcmp.eq.s32.totalorder %v1931_v4, %v1935_v6  ;;  %v815_v58 = vld [vmem:[%s2158_s2] sm:$0xff]  ;;  %s1615_s21 = sshll.u32 %s1882_s20, 4  ;;  %s1616_s21 = int_to_ptr.vmem [resolvable:$true] %s1615_s21 }
   0x7   :  { %v819_v61 = vld [vmem:[%s2159_s3] sm:$0xff]  ;;  %p1861_p1 = scmp.lt.s32.totalorder %s1616_s21, %s1616_s21 }
   0x8   :  { %vm35_vm1 = vcmp.eq.s32.totalorder %v1931_v4, %v1937_v7  ;;  %vm43_vm2 = vcmp.eq.s32.totalorder %v1931_v4, %v1939_v8 }
   0x9   :  { %1728 = vmatpush3.msk.msra.mxu0 %vm35_vm1, %v1880_v9  ;;  %1735 = vmatpush3.msk.msra.mxu1 %vm43_vm2, %v1880_v9 }
   0xa   :  { %1729 = vmatprep.subr.mxu0 %v1878_v1  ;;  %1736 = vmatprep.subr.mxu1 %v1878_v1 }
   0xb   :  { %1730 = vmatpush3.msk.msra.mxu0 %vm34_vm3, %v1880_v9  ;;  %1737 = vmatpush3.msk.msra.mxu1 %vm42_vm4, %v1880_v9 }
   0xc   :  { %1732 = vmatmul.mubr.msk.f32.vlgmr.msra.gmra.mxu0 %vm49_vm5, %v48_v10  ;;  %1739 = vmatmul.mubr.msk.f32.vlgmr.msra.gmra.mxu1 %vm49_vm5, %v48_v10 }
   0xd   :  { %1741 = vmatprep.subr.mxu0 %v1878_v1  ;;  %1743 = vmatprep.mubr.msk.f32.mxu0 %vm1879_vm0, %v1878_v1 }
   0xe   :  { %1742 = vmatpush3.msk.msra.mxu0 %vm200_vm6, %v48_v10  ;;  %1746 = vmatprep.subr.mxu1 %v1878_v1 }
   0xf   :  { %1751 = vmatprep.subr.mxu0 %v1878_v1  ;;  %1748 = vmatprep.mubr.msk.f32.mxu1 %vm1879_vm0, %v1878_v1 }
  0x10   :  { %1744 = vmatmul.mubr.msk.f32.vlgmr.msra.gmra.mxu0 %vm196_vm7, %v1638_v11 }
  0x11   :  { %1753 = vmatprep.mubr.msk.f32.mxu0 %vm1879_vm0, %v1878_v1 }
  0xcc   :  { %v119_v14 = vpop.f32.mrf.mxu0  ;;  %v189_v15 = vpop.f32.mrf.mxu1 }
  0xcd   :  { %1747 = vmatpush3.msk.msra.mxu1 %vm200_vm6, %v119_v14  ;;  %1752 = vmatpush3.msk.msra.mxu0 %vm200_vm6, %v189_v15  ;;  %v1668_v14 = vld [vmem:[%s2160_s4 + $0x10] sm:$0xff] }
  0xce   :  { %v1733_v16 = vpop.f32.mrf.mxu0  ;;  %v1740_v17 = vpop.f32.mrf.mxu1  ;;  %1749 = vmatmul.mubr.msk.f32.vlgmr.msra.gmra.mxu1 %vm196_vm7, %v193_v12  ;;  %1754 = vmatmul.mubr.msk.f32.vlgmr.msra.gmra.mxu0 %vm196_vm7, %v1643_v13 }
  0xcf   :  { %1756 = vmatprep.subr.mxu1 %v1878_v1  ;;  %1763 = vmatprep.subr.mxu0 %v1878_v1 }
  0xd0   :  { %1757 = vmatpush3.msk.msra.mxu1 %vm35_vm1, %v1880_v9  ;;  %1764 = vmatpush3.msk.msra.mxu0 %vm43_vm2, %v1880_v9  ;;  %v269_v18 = vpop.f32.mrf.mxu0 }
  0xd1   :  { %1758 = vmatprep.subr.mxu1 %v1878_v1  ;;  %1765 = vmatprep.subr.mxu0 %v1878_v1 }
  0xd2   :  { %1759 = vmatpush3.msk.msra.mxu1 %vm34_vm3, %v1880_v9  ;;  %1760 = vmatprep.mubr.msk.f32.mxu1 %vm1879_vm0, %v1878_v1  ;;  %v1745_v20 = vpop.f32.mrf.mxu0 }
  0xd3   :  { %1766 = vmatpush3.msk.msra.mxu0 %vm42_vm4, %v1880_v9  ;;  %1767 = vmatprep.mubr.msk.f32.mxu0 %vm1879_vm0, %v1878_v1 }
  0xd4   :  { %1761 = vmatmul.mubr.msk.f32.vlgmr.msra.gmra.mxu1 %vm49_vm5, %v1646_v19  ;;  %1768 = vmatmul.mubr.msk.f32.vlgmr.msra.gmra.mxu0 %vm49_vm5, %v1646_v19 }
  0xd5   :  { %1770 = vmatprep.subr.mxu1 %v1878_v1  ;;  %1772 = vmatprep.mubr.msk.f32.mxu1 %vm1879_vm0, %v1878_v1 }
  0xd6   :  { %1771 = vmatpush3.msk.msra.mxu1 %vm200_vm6, %v1646_v19  ;;  %1775 = vmatprep.subr.mxu0 %v1878_v1 }
  0xd7   :  { %1780 = vmatprep.subr.mxu1 %v1878_v1  ;;  %1777 = vmatprep.mubr.msk.f32.mxu0 %vm1879_vm0, %v1878_v1 }
  0xd8   :  { %1773 = vmatmul.mubr.msk.f32.vlgmr.msra.gmra.mxu1 %vm196_vm7, %v1638_v11 }
  0xd9   :  { %1782 = vmatprep.mubr.msk.f32.mxu1 %vm1879_vm0, %v1878_v1 }
 0x18e   :  { %v345_v21 = vpop.f32.mrf.mxu1  ;;  %v423_v22 = vpop.f32.mrf.mxu0 }
 0x18f   :  { %v346_v23 = vadd.f32 %v345_v21, %v269_v18 }
 0x190   :  { %v1750_v24 = vpop.f32.mrf.mxu1  ;;  %v1755_v25 = vpop.f32.mrf.mxu0 }
 0x191   :  { %v2036_v26 = vadd.f32 %v423_v22, %v346_v23 }
 0x193   :  { %v428_v27 = vsel %vm49_vm5, %v2036_v26, 0.0  ;;  %v432_v28 = vmul.f32 %v2036_v26, %v2036_v26 }
 0x194   :  { %v508_v29 = vpop.f32.mrf.mxu1  ;;  %v578_v30 = vpop.f32.mrf.mxu0  ;;  %429 = vadd.xlane.f32.xlu0 %v428_v27 }
 0x195   :  { %1776 = vmatpush3.msk.msra.mxu0 %vm200_vm6, %v508_v29  ;;  %1781 = vmatpush3.msk.msra.mxu1 %vm200_vm6, %v578_v30  ;;  %v433_v31 = vsel %vm49_vm5, %v432_v28, 0.0 }
 0x196   :  { %v1762_v32 = vpop.f32.mrf.mxu1  ;;  %1778 = vmatmul.mubr.msk.f32.vlgmr.msra.gmra.mxu0 %vm196_vm7, %v193_v12  ;;  %v1769_v33 = vpop.f32.mrf.mxu0  ;;  %1783 = vmatmul.mubr.msk.f32.vlgmr.msra.gmra.mxu1 %vm196_vm7, %v1643_v13  ;;  %v1665_v12 = vld [vmem:[%s2160_s4 + $0x8] sm:$0xff]  ;;  %v978_v13 = vld [vmem:[%s2160_s4] sm:$0xff] }
 0x197   :  { %434 = vadd.xlane.f32.xlu1 %v433_v31  ;;  %1785 = vmatprep.subr.mxu0 %v1878_v1 }
 0x198   :  { %1786 = vmatpush3.msk.msra.mxu0 %vm35_vm1, %v1880_v9  ;;  %1792 = vmatprep.subr.mxu1 %v1878_v1  ;;  %v650_v34 = vpop.f32.mrf.mxu1 }
 0x199   :  { %1787 = vmatprep.subr.mxu0 %v1878_v1  ;;  %1793 = vmatpush3.msk.msra.mxu1 %vm43_vm2, %v1880_v9 }
 0x19a   :  { %1788 = vmatpush3.msk.msra.mxu0 %vm34_vm3, %v1880_v9  ;;  %1794 = vmatprep.subr.mxu1 %v1878_v1  ;;  %v1774_v35 = vpop.f32.mrf.mxu1 }
 0x19b   :  { %1789 = vmatprep.mubr.msk.f32.mxu0 %vm1879_vm0, %v1878_v1  ;;  %1795 = vmatpush3.msk.msra.mxu1 %vm42_vm4, %v1880_v9 }
 0x19c   :  { %1796 = vmatprep.mubr.msk.f32.mxu1 %vm1879_vm0, %v1878_v1  ;;  %1799 = vmatprep.subr.mxu0 %v1878_v1 }
 0x19d   :  { %1804 = vmatprep.subr.mxu1 %v1878_v1 }
 0x21d   :  { %v430_v46 = vpop.xlane.xlu0 %429 }
 0x220   :  { %v435_v47 = vpop.xlane.xlu1 %434 }
 0x256   :  { %v723_v36 = vpop.f32.mrf.mxu0  ;;  %v796_v37 = vpop.f32.mrf.mxu1 }
 0x257   :  { %v724_v38 = vadd.f32 %v723_v36, %v650_v34 }
 0x258   :  { %v1779_v39 = vpop.f32.mrf.mxu0  ;;  %v1784_v40 = vpop.f32.mrf.mxu1 }
 0x259   :  { %v800_v41 = vadd.f32 %v796_v37, %v724_v38 }
 0x25b   :  { %v801_v42 = vsel %vm49_vm5, %v800_v41, 0.0  ;;  %v805_v43 = vmul.f32 %v800_v41, %v800_v41 }
 0x25c   :  { %802 = vadd.xlane.f32.xlu0 %v801_v42 }
 0x25d   :  { %v806_v44 = vsel %vm49_vm5, %v805_v43, 0.0 }
 0x25e   :  { %807 = vadd.xlane.f32.xlu1 %v806_v44 }
 0x2e5   :  { %v803_v48 = vpop.xlane.xlu0 %802 }
 0x2e6   :  { %v804_v49 = vadd.f32 %v803_v48, %v430_v46 }
 0x2e7   :  { %v808_v50 = vpop.xlane.xlu1 %807 }
 0x2e8   :  { %v810_v51 = vmul.f32 0.03125, %v804_v49  ;;  %v809_v52 = vadd.f32 %v808_v50, %v435_v47 }
 0x2ea   :  { %v812_v53 = vmul.f32 %v810_v51, %v810_v51  ;;  %v811_v54 = vmul.f32 0.03125, %v809_v52 }
 0x2ec   :  { %v813_v55 = vsub.f32 %v811_v54, %v812_v53  ;;  %v1584_v53 = vld [vmem:[%s2161_s5] sm:$0xff]  ;;  %s1856_s5 = scalar_lea.vmem %s1616_s21, 256 }
 0x2ed   :  { %p1857_p0 = scmp.ne.s32.totalorder %s1616_s21, %s1856_s5  ;;  %p1862_p2 = scmp.lt.s32.totalorder %s1856_s5, %s1856_s5 }
 0x2ee   :  { %v814_v56 = vmax.f32 %v813_v55, 0.0 }
 0x2ef   :  { %p1863_p3 = por %p1862_p2, %p1861_p1 }
 0x2f0   :  { %v816_v57 = vadd.f32 1e-05, %v814_v56  ;;  %v1588_v56 = vld [vmem:[%s2162_s6] sm:$0xff] }
 0x2f1   :  { %p1864_p4 = pnand %p1863_p3, %p1857_p0 }
 0x2f2   :  { %1852 = vrsqrt.f32 %v816_v57 }
 0x2ff   :  { %v1853_v59 = vpop.eup %1852 }
 0x300   :  { %v818_v60 = vmul.f32 %v1853_v59, %v815_v58 }
 0x302   :  { %824 = vperm.xlu0 %1850, %v818_v60   ;;  %v820_v62 = vmul.f32 %v818_v60, %v810_v51 }
 0x304   :  { %v821_v63 = vsub.f32 %v819_v61, %v820_v62 }
 0x306   :  { %830 = vperm.xlu1 %1851, %v821_v63  }
 0x37d   :  { %v825_v0 = vpop.permute.xlu0 %824 }
 0x37e   :  { %v827_v2 = vmul.f32 %v825_v0, %v2036_v26  ;;  %v1213_v15 = vmul.f32 %v825_v0, %v800_v41 }
 0x381   :  { %v831_v3 = vpop.permute.xlu1 %830 }
 0x382   :  { %v833_v10 = vadd.f32 %v831_v3, %v827_v2  ;;  %v1214_v18 = vadd.f32 %v1213_v15, %v831_v3 }
 0x384   :  { %v834_v11 = vmax.f32 %v833_v10, 0.0  ;;  %v1215_v22 = vmax.f32 %v1214_v18, 0.0 }
 0x386   :  { %1790 = vmatmul.mubr.msk.f32.vlgmr.msra.gmra.mxu0 %vm49_vm5, %v834_v11  ;;  %1797 = vmatmul.mubr.msk.f32.vlgmr.msra.gmra.mxu1 %vm49_vm5, %v834_v11 }
 0x387   :  { %1800 = vmatpush3.msra.mxu0 %v834_v11  ;;  %1801 = vmatprep.mubr.msk.f32.mxu0 %vm1879_vm0, %v1878_v1 }
 0x388   :  { %1809 = vmatprep.subr.mxu0 %v1878_v1  ;;  %1806 = vmatprep.mubr.msk.f32.mxu1 %vm1879_vm0, %v1878_v1 }
 0x38a   :  { %1802 = vmatmul.mubr.msk.f32.vlgmr.msra.gmra.mxu0 %vm981_vm8, %v1665_v12 }
 0x38b   :  { %1811 = vmatprep.mubr.msk.f32.mxu0 %vm1879_vm0, %v1878_v1 }
 0x446   :  { %v904_v16 = vpop.f32.mrf.mxu0  ;;  %v974_v17 = vpop.f32.mrf.mxu1 }
 0x447   :  { %1805 = vmatpush3.msra.mxu1 %v904_v16  ;;  %1810 = vmatpush3.msra.mxu0 %v974_v17 }
 0x448   :  { %v1791_v19 = vpop.f32.mrf.mxu0  ;;  %v1798_v20 = vpop.f32.mrf.mxu1  ;;  %1807 = vmatmul.mubr.msk.f32.vlgmr.msra.gmra.mxu1 %vm981_vm8, %v978_v13  ;;  %1812 = vmatmul.mubr.msk.f32.vlgmr.msra.gmra.mxu0 %vm981_vm8, %v1668_v14 }
 0x449   :  { %1814 = vmatprep.subr.mxu1 %v1878_v1  ;;  %1821 = vmatprep.subr.mxu0 %v1878_v1 }
 0x44a   :  { %1815 = vmatpush3.msk.msra.mxu1 %vm35_vm1, %v1880_v9  ;;  %1822 = vmatpush3.msk.msra.mxu0 %vm43_vm2, %v1880_v9  ;;  %v1051_v21 = vpop.f32.mrf.mxu0 }
 0x44b   :  { %1816 = vmatprep.subr.mxu1 %v1878_v1  ;;  %1823 = vmatprep.subr.mxu0 %v1878_v1 }
 0x44c   :  { %1817 = vmatpush3.msk.msra.mxu1 %vm34_vm3, %v1880_v9  ;;  %1818 = vmatprep.mubr.msk.f32.mxu1 %vm1879_vm0, %v1878_v1  ;;  %v1803_v7 = vpop.f32.mrf.mxu0 }
 0x44d   :  { %1824 = vmatpush3.msk.msra.mxu0 %vm42_vm4, %v1880_v9  ;;  %1825 = vmatprep.mubr.msk.f32.mxu0 %vm1879_vm0, %v1878_v1 }
 0x44e   :  { %1819 = vmatmul.mubr.msk.f32.vlgmr.msra.gmra.mxu1 %vm49_vm5, %v1215_v22  ;;  %1826 = vmatmul.mubr.msk.f32.vlgmr.msra.gmra.mxu0 %vm49_vm5, %v1215_v22 }
 0x44f   :  { %1828 = vmatprep.subr.mxu1 %v1878_v1  ;;  %1830 = vmatprep.mubr.msk.f32.mxu1 %vm1879_vm0, %v1878_v1 }
 0x450   :  { %1829 = vmatpush3.msra.mxu1 %v1215_v22  ;;  %1833 = vmatprep.subr.mxu0 %v1878_v1 }
 0x451   :  { %1838 = vmatprep.subr.mxu1 %v1878_v1  ;;  %1835 = vmatprep.mubr.msk.f32.mxu0 %vm1879_vm0, %v1878_v1 }
 0x452   :  { %1831 = vmatmul.mubr.msk.f32.vlgmr.msra.gmra.mxu1 %vm981_vm8, %v1665_v12 }
 0x453   :  { %1840 = vmatprep.mubr.msk.f32.mxu1 %vm1879_vm0, %v1878_v1 }
 0x508   :  { %v1124_v4 = vpop.f32.mrf.mxu1  ;;  %v1199_v5 = vpop.f32.mrf.mxu0 }
 0x509   :  { %v1125_v6 = vadd.f32 %v1124_v4, %v1051_v21 }
 0x50a   :  { %v1808_v8 = vpop.f32.mrf.mxu1  ;;  %v1813_v9 = vpop.f32.mrf.mxu0 }
 0x50b   :  { %v1203_v23 = vadd.f32 %v1199_v5, %v1125_v6 }
 0x50d   :  { %v1204_v24 = vsel %vm49_vm5, %v1203_v23, 0.0  ;;  %v1208_v25 = vmul.f32 %v1203_v23, %v1203_v23 }
 0x50e   :  { %v1285_v26 = vpop.f32.mrf.mxu1  ;;  %v1355_v27 = vpop.f32.mrf.mxu0  ;;  %1205 = vadd.xlane.f32.xlu1 %v1204_v24 }
 0x50f   :  { %1834 = vmatpush3.msra.mxu0 %v1285_v26  ;;  %1839 = vmatpush3.msra.mxu1 %v1355_v27  ;;  %v1209_v1 = vsel %vm49_vm5, %v1208_v25, 0.0 }
 0x510   :  { %v1820_v28 = vpop.f32.mrf.mxu1  ;;  %1836 = vmatmul.mubr.msk.f32.vlgmr.msra.gmra.mxu0 %vm981_vm8, %v978_v13  ;;  %v1827_v29 = vpop.f32.mrf.mxu0  ;;  %1841 = vmatmul.mubr.msk.f32.vlgmr.msra.gmra.mxu1 %vm981_vm8, %v1668_v14 }
 0x512   :  { %1210 = vadd.xlane.f32.xlu1 %v1209_v1  ;;  %v1425_v30 = vpop.f32.mrf.mxu1 }
 0x514   :  { %v1832_v31 = vpop.f32.mrf.mxu1 }
 0x597   :  { %v1206_v41 = vpop.xlane.xlu1 %1205 }
 0x59b   :  { %v1211_v42 = vpop.xlane.xlu1 %1210 }
 0x5d0   :  { %v1495_v32 = vpop.f32.mrf.mxu0  ;;  %v1565_v33 = vpop.f32.mrf.mxu1 }
 0x5d1   :  { %v1496_v34 = vadd.f32 %v1495_v32, %v1425_v30 }
 0x5d2   :  { %v1837_v35 = vpop.f32.mrf.mxu0  ;;  %v1842_v36 = vpop.f32.mrf.mxu1 }
 0x5d3   :  { %v1569_v37 = vadd.f32 %v1565_v33, %v1496_v34 }
 0x5d5   :  { %v1570_v38 = vsel %vm49_vm5, %v1569_v37, 0.0  ;;  %v1574_v39 = vmul.f32 %v1569_v37, %v1569_v37 }
 0x5d6   :  { %1571 = vadd.xlane.f32.xlu0 %v1570_v38 }
 0x5d7   :  { %v1575_v40 = vsel %vm49_vm5, %v1574_v39, 0.0 }
 0x5d8   :  { %1576 = vadd.xlane.f32.xlu1 %v1575_v40 }
 0x65f   :  { %v1572_v43 = vpop.xlane.xlu0 %1571 }
 0x660   :  { %v1573_v44 = vadd.f32 %v1572_v43, %v1206_v41 }
 0x661   :  { %v1577_v45 = vpop.xlane.xlu1 %1576 }
 0x662   :  { %v1579_v46 = vmul.f32 0.03125, %v1573_v44  ;;  %v1578_v47 = vadd.f32 %v1577_v45, %v1211_v42 }
 0x664   :  { %v1581_v48 = vmul.f32 %v1579_v46, %v1579_v46  ;;  %v1580_v49 = vmul.f32 0.03125, %v1578_v47 }
 0x666   :  { %v1582_v50 = vsub.f32 %v1580_v49, %v1581_v48 }
 0x668   :  { %v1583_v51 = vmax.f32 %v1582_v50, 0.0 }
 0x66a   :  { %v1585_v52 = vadd.f32 1e-05, %v1583_v51 }
 0x66c   :  { %1854 = vrsqrt.f32 %v1585_v52 }
 0x679   :  { %v1855_v54 = vpop.eup %1854 }
 0x67a   :  { %v1587_v55 = vmul.f32 %v1855_v54, %v1584_v53 }
 0x67c   :  { %1593 = vperm.xlu1 %1851, %v1587_v55   ;;  %v1589_v57 = vmul.f32 %v1587_v55, %v1579_v46 }
 0x67e   :  { %v1590_v58 = vsub.f32 %v1588_v56, %v1589_v57 }
 0x680   :  { %1599 = vperm.xlu0 %1850, %v1590_v58  }
 0x6f7   :  { %v1594_v59 = vpop.permute.xlu1 %1593 }
 0x6f8   :  { %v1596_v60 = vmul.f32 %v1594_v59, %v1203_v23  ;;  %v1605_v61 = vmul.f32 %v1594_v59, %v1569_v37 }
 0x6fb   :  { %v1600_v62 = vpop.permute.xlu0 %1599 }
 0x6fc   :  { %v1602_v63 = vadd.f32 %v1600_v62, %v1596_v60  ;;  %v1606_v0 = vadd.f32 %v1605_v61, %v1600_v62 }
 0x6fe   :  { %v1603_v2 = vmax.f32 %v1602_v63, 0.0  ;;  %v1607_v3 = vmax.f32 %v1606_v0, 0.0 }
 0x700   :  { %1604 = vst.msk [vmem:[#allocation2] sm:$0xff] %vm49_vm5, %v1603_v2  ;;  %1609 = vst.msk [vmem:[#allocation2 + $0x8] sm:$0xff] %vm49_vm5, %v1607_v3 }
 0x701   :  { %1867 = shalt.err (!%p1864_p4)
}
 0x702   :  { %s1883_s6 = smov 128   ;;  %s1884_s22 = smov 8  }
 0x703   :  { %1621 = dma.vmem_to_hbm [thread:$0]  %s1616_s21, 256, %s2163_s7, [#allocation3], %s1883_s6, %s1883_s6, %s1884_s22  }
 0x704   :  { %1876 = dma.done.wait [#allocation3], 256  }
 0x705   :  { %1877 = vsyncadd [#allocation3], 4294967040 }
 0x706   :  { %1625 = vsyncpa [#allocation3], 1 }

</bundles_post_ra>
